<compile_context>
chip_gen: v7x
topology: tpu7x:2x2x1
jax: 0.10.0
libtpu: 0.0.40
codegen_flags: <defaults>
</compile_context>

<pallas_src>
import functools

import jax
import jax.numpy as jnp
from jax.experimental import pallas as pl
from jax.experimental.pallas import tpu as pltpu


def _round_up(x, m):
    return (x + m - 1) // m * m


def _cdiv(a, b):
    return (a + b - 1) // b


def _pick_tile(dim, t_max, align):
    """Aligned tile size that balances tiles against the real extent.

    dim <= t_max  -> single full-extent block (allowed by Pallas, zero waste).
    dim >  t_max  -> smallest aligned tile that covers dim in ceil(dim/t_max)
                     tiles, so padded waste in the edge block is minimized.
    """
    if dim <= t_max:
        return dim
    n_tiles = _cdiv(dim, t_max)
    return _round_up(_cdiv(dim, n_tiles), align)


def linear_relu_kernel(x_ref, w_ref, b_ref, o_ref, acc_ref):
    k = pl.program_id(2)

    # First K step writes the accumulator directly (no zero-init round trip).
    @pl.when(k == 0)
    def _():
        acc_ref[...] = jnp.dot(
            x_ref[...], w_ref[...], preferred_element_type=jnp.float32)

    @pl.when(k > 0)
    def _():
        acc_ref[...] += jnp.dot(
            x_ref[...], w_ref[...], preferred_element_type=jnp.float32)

    # Epilogue once per output tile: bias add + ReLU + store.
    @pl.when(k == pl.num_programs(2) - 1)
    def _():
        out = jnp.maximum(acc_ref[...] + b_ref[...], 0.0)
        o_ref[...] = out.astype(o_ref.dtype)


@functools.partial(
    jax.jit,
    static_argnames=("tm_max", "tn_max", "tk_max", "compute_dtype", "out_dtype"))
def linear_basic_block(x, weight, bias, *, tm_max=512, tn_max=512, tk_max=1024,
                       compute_dtype=jnp.bfloat16, out_dtype=None):
    """Forward of Linear_BasicBlock: relu(x @ weight + bias).

    x:      (B, In)
    weight: (In, Out)   (transpose of PyTorch's Linear layout)
    bias:   (Out,)
    compute_dtype: MXU input dtype (bf16 default, f32 accumulate either way).
    out_dtype: output dtype (defaults to x.dtype).
    """
    B, In = x.shape
    Out = weight.shape[1]
    compute_dtype = jnp.dtype(compute_dtype)
    out_dtype = jnp.dtype(out_dtype) if out_dtype is not None else jnp.dtype(x.dtype)
    in_bytes = compute_dtype.itemsize

    m_align = 16 if in_bytes < 4 else 8          # bf16 packs 2 rows / sublane
    n_align = 128                                # lane width
    k_align = 256 if tk_max >= 256 else 128      # v6e/v7x MXU pass is 256x256

    tm = _pick_tile(B, tm_max, m_align)
    tn = _pick_tile(Out, tn_max, n_align)

    # v7x has 2 TensorCores; make sure the two "parallel" grid axes expose at
    # least 2 tiles when the shape allows it (near-zero cost on v5e/v6e).
    if _cdiv(B, tm) * _cdiv(Out, tn) == 1:
        if Out >= 2 * n_align:
            tn = _round_up(_cdiv(Out, 2), n_align)
        elif B >= 2 * m_align:
            tm = _round_up(_cdiv(B, 2), m_align)

    # K (reduction) tiling.  Only this axis is ever zero-padded: garbage in a
    # padded K region would feed directly into valid accumulator entries.
    if In <= tk_max:
        tk, Kp = In, In
    else:
        nk_tiles = _cdiv(In, tk_max)
        tk = _round_up(_cdiv(In, nk_tiles), k_align)
        Kp = _round_up(In, tk)

    x_c = x.astype(compute_dtype)
    w_c = weight.astype(compute_dtype)
    if Kp != In:
        x_c = jnp.pad(x_c, ((0, 0), (0, Kp - In)))
        w_c = jnp.pad(w_c, ((0, Kp - In), (0, 0)))
    b_row = bias.reshape(1, Out).astype(jnp.float32)

    grid = (_cdiv(B, tm), _cdiv(Out, tn), Kp // tk)

    # Scoped-VMEM budget: double-buffered inputs/outputs + f32 accumulator,
    # with headroom; capped well below v7x's 64 MiB physical VMEM.
    out_bytes = out_dtype.itemsize
    vmem_need = (2 * (tm * tk + tk * tn) * in_bytes
                 + 2 * tm * tn * out_bytes
                 + tm * tn * 4
                 + 2 * tn * 4)
    vmem_limit = int(min(max(2 * vmem_need, 16 << 20), 48 << 20))

    return pl.pallas_call(
        linear_relu_kernel,
        out_shape=jax.ShapeDtypeStruct((B, Out), out_dtype),
        grid_spec=pltpu.PrefetchScalarGridSpec(
            num_scalar_prefetch=0,
            grid=grid,
            in_specs=[
                pl.BlockSpec((tm, tk), lambda i, j, k: (i, k)),   # x tile
                pl.BlockSpec((tk, tn), lambda i, j, k: (k, j)),   # W tile
                pl.BlockSpec((1, tn), lambda i, j, k: (0, j)),    # bias row
            ],
            out_specs=pl.BlockSpec((tm, tn), lambda i, j, k: (i, j)),
            scratch_shapes=[pltpu.VMEM((tm, tn), jnp.float32)],
        ),
        compiler_params=pltpu.CompilerParams(
            dimension_semantics=("parallel", "parallel", "arbitrary"),
            vmem_limit_bytes=vmem_limit,
        ),
    )(x_c, w_c, b_row)


if __name__ == "__main__":
    key = jax.random.PRNGKey(0)
    kx, kw, kb, kx2, kw2, kb2, kx3, kw3, kb3 = jax.random.split(key, 9)

    # --- 1) Small shape, strict-f32 path (tight tolerance vs. PyTorch math). ---
    batch, input_size, output_size = 8, 32, 16
    x = jax.random.normal(kx, (batch, input_size), dtype=jnp.float32)
    bound = 1.0 / jnp.sqrt(jnp.float32(input_size))
    w = jax.random.uniform(kw, (input_size, output_size), dtype=jnp.float32,
                           minval=-bound, maxval=bound)
    b = jax.random.uniform(kb, (output_size,), dtype=jnp.float32,
                           minval=-bound, maxval=bound)

    out = jax.block_until_ready(
        linear_basic_block(x, w, b, compute_dtype=jnp.float32))
    ref = jnp.maximum(x @ w + b, 0.0)
    assert out.shape == (batch, output_size)
    assert out.dtype == jnp.float32
    assert jnp.allclose(out, ref, atol=1e-5, rtol=1e-5)

    # --- 2) Default bf16 path, ragged N (partial edge block, no M/N padding). ---
    B2, In2, Out2 = 256, 384, 640
    x2 = jax.random.normal(kx2, (B2, In2), dtype=jnp.float32)
    bound2 = 1.0 / jnp.sqrt(jnp.float32(In2))
    w2 = jax.random.uniform(kw2, (In2, Out2), dtype=jnp.float32,
                            minval=-bound2, maxval=bound2)
    b2 = jax.random.uniform(kb2, (Out2,), dtype=jnp.float32,
                            minval=-bound2, maxval=bound2)

    out2 = jax.block_until_ready(linear_basic_block(x2, w2, b2))
    x2b = x2.astype(jnp.bfloat16).astype(jnp.float32)
    w2b = w2.astype(jnp.bfloat16).astype(jnp.float32)
    ref2 = jnp.maximum(x2b @ w2b + b2, 0.0)
    assert out2.shape == (B2, Out2)
    assert jnp.allclose(out2, ref2, atol=1e-3, rtol=1e-3)

    # --- 3) Multi-K accumulation + K-only zero padding + split parallel axis. ---
    B3, In3, Out3 = 64, 200, 192
    x3 = jax.random.normal(kx3, (B3, In3), dtype=jnp.float32)
    bound3 = 1.0 / jnp.sqrt(jnp.float32(In3))
    w3 = jax.random.uniform(kw3, (In3, Out3), dtype=jnp.float32,
                            minval=-bound3, maxval=bound3)
    b3 = jax.random.uniform(kb3, (Out3,), dtype=jnp.float32,
                            minval=-bound3, maxval=bound3)

    out3 = jax.block_until_ready(
        linear_basic_block(x3, w3, b3, tk_max=128))   # grid (2, 1, 2), Kp=256
    x3b = x3.astype(jnp.bfloat16).astype(jnp.float32)
    w3b = w3.astype(jnp.bfloat16).astype(jnp.float32)
    ref3 = jnp.maximum(x3b @ w3b + b3, 0.0)
    assert out3.shape == (B3, Out3)
    assert jnp.allclose(out3, ref3, atol=1e-3, rtol=1e-3)

    print("KERNEL_OK")
</pallas_src>

<mosaic_0001>
module attributes {stable_mosaic.version = 11 : i64} {
  func.func @linear_relu_kernel(%arg0: i32, %arg1: i32, %arg2: i32, %arg3: memref<8x32xf32, #tpu.memory_space<vmem>>, %arg4: memref<32x16xf32, #tpu.memory_space<vmem>>, %arg5: memref<1x16xf32, #tpu.memory_space<vmem>>, %arg6: memref<8x16xf32, #tpu.memory_space<vmem>>, %arg7: memref<8x16xf32, #tpu.memory_space<vmem>>) attributes {dimension_semantics = [#tpu.dimension_semantics<parallel>, #tpu.dimension_semantics<parallel>, #tpu.dimension_semantics<arbitrary>], iteration_bounds = array<i64: 1, 1, 1>, scalar_prefetch = 0 : i64, scratch_operands = 1 : i64, tpu.core_type = #tpu.core_type<tc>, window_params = [{transform_indices = @transform_0, window_bounds = array<i64: 8, 32>}, {transform_indices = @transform_1, window_bounds = array<i64: 32, 16>}, {transform_indices = @transform_2, window_bounds = array<i64: 1, 16>}, {transform_indices = @transform_3, window_bounds = array<i64: 8, 16>}]} {
    %c0_i32 = arith.constant 0 : i32
    %0 = arith.cmpi eq, %arg2, %c0_i32 : i32
    %1 = arith.extui %0 : i1 to i32
    %c0_i32_0 = arith.constant 0 : i32
    %2 = arith.cmpi ne, %1, %c0_i32_0 : i32
    scf.if %2 {
      %c0 = arith.constant 0 : index
      %c0_5 = arith.constant 0 : index
      %9 = vector.load %arg3[%c0, %c0_5] : memref<8x32xf32, #tpu.memory_space<vmem>>, vector<8x32xf32>
      %c0_6 = arith.constant 0 : index
      %c0_7 = arith.constant 0 : index
      %10 = vector.load %arg4[%c0_6, %c0_7] : memref<32x16xf32, #tpu.memory_space<vmem>>, vector<32x16xf32>
      %cst = arith.constant dense<0.000000e+00> : vector<8x16xf32>
      %11 = tpu.matmul %9, %10, %cst {dimension_numbers = #tpu.dot_dimension_numbers<[1], [0], [0], [1], [0, 0, 1, 1], [], []>} : vector<8x32xf32>, vector<32x16xf32>, vector<8x16xf32> -> vector<8x16xf32>
      %c0_8 = arith.constant 0 : index
      %c0_9 = arith.constant 0 : index
      %12 = vector.load %arg7[%c0_8, %c0_9] : memref<8x16xf32, #tpu.memory_space<vmem>>, vector<8x16xf32>
      tpu.vector_store %arg7[%c0_8, %c0_9], %11 {strides = array<i32>} : memref<8x16xf32, #tpu.memory_space<vmem>>, vector<8x16xf32>,
    } else {
    }
    %c0_i32_1 = arith.constant 0 : i32
    %3 = arith.cmpi sgt, %arg2, %c0_i32_1 : i32
    %4 = arith.extui %3 : i1 to i32
    %c0_i32_2 = arith.constant 0 : i32
    %5 = arith.cmpi ne, %4, %c0_i32_2 : i32
    scf.if %5 {
      %c0 = arith.constant 0 : index
      %c0_5 = arith.constant 0 : index
      %9 = vector.load %arg7[%c0, %c0_5] : memref<8x16xf32, #tpu.memory_space<vmem>>, vector<8x16xf32>
      %c0_6 = arith.constant 0 : index
      %c0_7 = arith.constant 0 : index
      %10 = vector.load %arg3[%c0_6, %c0_7] : memref<8x32xf32, #tpu.memory_space<vmem>>, vector<8x32xf32>
      %c0_8 = arith.constant 0 : index
      %c0_9 = arith.constant 0 : index
      %11 = vector.load %arg4[%c0_8, %c0_9] : memref<32x16xf32, #tpu.memory_space<vmem>>, vector<32x16xf32>
      %cst = arith.constant dense<0.000000e+00> : vector<8x16xf32>
      %12 = tpu.matmul %10, %11, %cst {dimension_numbers = #tpu.dot_dimension_numbers<[1], [0], [0], [1], [0, 0, 1, 1], [], []>} : vector<8x32xf32>, vector<32x16xf32>, vector<8x16xf32> -> vector<8x16xf32>
      %13 = arith.addf %9, %12 : vector<8x16xf32>
      %c0_10 = arith.constant 0 : index
      %c0_11 = arith.constant 0 : index
      %14 = vector.load %arg7[%c0_10, %c0_11] : memref<8x16xf32, #tpu.memory_space<vmem>>, vector<8x16xf32>
      tpu.vector_store %arg7[%c0_10, %c0_11], %13 {strides = array<i32>} : memref<8x16xf32, #tpu.memory_space<vmem>>, vector<8x16xf32>,
    } else {
    }
    %c0_i32_3 = arith.constant 0 : i32
    %6 = arith.cmpi eq, %arg2, %c0_i32_3 : i32
    %7 = arith.extui %6 : i1 to i32
    %c0_i32_4 = arith.constant 0 : i32
    %8 = arith.cmpi ne, %7, %c0_i32_4 : i32
    scf.if %8 {
      %c0 = arith.constant 0 : index
      %c0_5 = arith.constant 0 : index
      %9 = vector.load %arg7[%c0, %c0_5] : memref<8x16xf32, #tpu.memory_space<vmem>>, vector<8x16xf32>
      %c0_6 = arith.constant 0 : index
      %c0_7 = arith.constant 0 : index
      %10 = vector.load %arg5[%c0_6, %c0_7] : memref<1x16xf32, #tpu.memory_space<vmem>>, vector<1x16xf32>
      %11 = vector.broadcast %10 : vector<1x16xf32> to vector<8x16xf32>
      %12 = arith.addf %9, %11 : vector<8x16xf32>
      %cst = arith.constant 0.000000e+00 : f32
      %13 = vector.broadcast %cst : f32 to vector<8x16xf32>
      %14 = arith.maximumf %12, %13 : vector<8x16xf32>
      %c0_8 = arith.constant 0 : index
      %c0_9 = arith.constant 0 : index
      %15 = vector.load %arg6[%c0_8, %c0_9] : memref<8x16xf32, #tpu.memory_space<vmem>>, vector<8x16xf32>
      tpu.vector_store %arg6[%c0_8, %c0_9], %14 {strides = array<i32>} : memref<8x16xf32, #tpu.memory_space<vmem>>, vector<8x16xf32>,
    } else {
    }
    return
  }
  func.func @transform_0(%arg0: i32, %arg1: i32, %arg2: i32) -> (i32, i32) {
    %c0_i32 = arith.constant 0 : i32
    return %arg0, %arg2 : i32, i32
  }
  func.func @transform_1(%arg0: i32, %arg1: i32, %arg2: i32) -> (i32, i32) {
    %c0_i32 = arith.constant 0 : i32
    return %arg2, %arg1 : i32, i32
  }
  func.func @transform_2(%arg0: i32, %arg1: i32, %arg2: i32) -> (i32, i32) {
    %c0_i32 = arith.constant 0 : i32
    %c0_i32_0 = arith.constant 0 : i32
    return %c0_i32, %arg1 : i32, i32
  }
  func.func @transform_3(%arg0: i32, %arg1: i32, %arg2: i32) -> (i32, i32) {
    %c0_i32 = arith.constant 0 : i32
    return %arg0, %arg1 : i32, i32
  }
}

</mosaic_0001>

<bundles_post_ra>
// kernel: linear_basic_block.1
= control target key start
LH: loop header
LB: loop body
LE: loop exit
PB: predicated region body
PF: predicated region fallthrough
CT: control target
= control target key end

     0   :  { %v269_v3 = vmov 0.0|0.0   ;;  %vm270_vm0 = vmmov 0   ;;  %v271_v6 = vmov 0.0   ;;  %s323_s0 = inlined_call_operand.vmem [shape: f32[8,32], index: 0, kind: input, shape index: {}]   ;;  %s324_s1 = inlined_call_operand.vmem [shape: f32[32,16], index: 1, kind: input, shape index: {}]   ;;  %s325_s2 = inlined_call_operand.vmem [shape: f32[1,16], index: 2, kind: input, shape index: {}]   ;;  %s326_s3 = inlined_call_operand.hbm [shape: f32[8,16], index: 3, kind: output, shape index: {}]  }
   0x1   :  { %v20_v0 = vld [vmem:[%s324_s1] sm:$0xff]  ;;  %v21_v1 = vld [vmem:[%s324_s1 + $0x8] sm:$0xff]  ;;  %v22_v2 = vld [vmem:[%s324_s1 + $0x10] sm:$0xff]  ;;  %235 = vmatprep.subr.bf16.mxu0 %v269_v3  ;;  %232 = vmatprep.mubr.msk.f32.mxu0 %vm270_vm0, %v271_v6 }
   0x2   :  { %v236_v4 = vpack.c.bf16 %v21_v1, %v20_v0  ;;  %v23_v5 = vld [vmem:[%s324_s1 + $0x18] sm:$0xff] }
   0x3   :  { %8 = vsyncpa [#allocation4], 0  ;;  %v239_v7 = vpack.c.bf16 %v23_v5, %v22_v2  ;;  %v19_v8 = vld [vmem:[%s323_s0] sm:$0xff]  ;;  %vm24_vm1 = vcmask 261120   ;;  %vm98_vm2 = vcmask 130048   ;;  %s272_s23 = smov [#allocation3]  }
   0x4   :  { %237 = vmatpush3.bf16.msra.mxu0 %v236_v4  ;;  %v218_v11 = vld [vmem:[%s325_s2] ss:$0 sm:$0xff]  ;;  %s208_s24 = sshll.u32 %s272_s23, 4  ;;  %s209_s24 = int_to_ptr.vmem [resolvable:$true] %s208_s24 }
   0x5   :  { %238 = vmatprep.subr.bf16.mxu0 %v269_v3  ;;  %s245_s25 = scalar_lea.vmem %s209_s24, 128  ;;  %p250_p1 = scmp.lt.s32.totalorder %s209_s24, %s209_s24 }
   0x6   :  { %p246_p0 = scmp.ne.s32.totalorder %s209_s24, %s245_s25  ;;  %p251_p2 = scmp.lt.s32.totalorder %s245_s25, %s245_s25 }
   0x8   :  { %240 = vmatpush3.bf16.msra.mxu0 %v239_v7  ;;  %p252_p3 = por %p251_p2, %p250_p1 }
   0xa   :  { %p253_p4 = pnand %p252_p3, %p246_p0 }
   0xb   :  { %233 = vmatmul.mubr.msk.f32.vlgmr.msra.gmra.mrb[0].mxu0 %vm24_vm1, %v19_v8 }
  0xde   :  { %v94_v9 = vpop.f32.mrb[0].mxu0 }
  0xdf   :  { %99 = vst.msk [vmem:[#allocation2] sm:$0xff] %vm98_vm2, %v94_v9  ;;  %v234_v10 = vpop.f32.mrb[1].mxu0 }
  0xe6   :  { %v190_v12 = vld [vmem:[#allocation2] sm:$0xff] }
  0xe7   :  { %v198_v13 = vadd.f32 %v218_v11, %v190_v12 }
  0xe9   :  { %v199_v14 = vmax.f32 %v198_v13, 0.0 }
  0xeb   :  { %201 = vst.msk [vmem:[#allocation3] sm:$0xff] %vm98_vm2, %v199_v14 }
  0xec   :  { %256 = shalt.err (!%p253_p4)
}
  0xed   :  { %s257_s27 = scalar_lea.hbm %s326_s3, 128 }
  0xee   :  { %p258_p5 = scmp.ne.s32.totalorder %s326_s3, %s257_s27  ;;  %p261_p6 = scmp.lt.u32.totalorder %s257_s27, %s326_s3 }
  0xf0   :  { %p263_p7 = pnand %p261_p6, %p258_p5 }
  0xf2   :  { %266 = shalt.err (!%p263_p7)
}
  0xf3   :  { %211 = dma.vmem_to_hbm [thread:$0]  %s209_s24, 128, %s326_s3, [#allocation4]  }
  0xf4   :  { %267 = dma.done.wait [#allocation4], 128  }
  0xf5   :  { %268 = vsyncadd [#allocation4], 4294967168 }
  0xf6   :  { %215 = vsyncpa [#allocation4], 1 }

</bundles_post_ra>
